<compile_context>
chip_gen: v7x
topology: tpu7x:2x2x1
jax: 0.10.0
libtpu: 0.0.40
codegen_flags: <defaults>
</compile_context>

<pallas_src>
import jax
import jax.numpy as jnp
from jax.experimental import pallas as pl
from jax.experimental.pallas import tpu as pltpu


def _domain_class_pl_kernel(prefix_ref, ctx_ref, suffix_ref, out_ref):
    # prefix_ref : (TM, 1,     D)  VMEM
    # ctx_ref    : (n_ctx,     D)  VMEM (same block every grid step)
    # suffix_ref : (TM, n_suf, D)  VMEM
    # out_ref    : (TM, seq,   D)  VMEM
    tm, _, d = out_ref.shape
    n_ctx = ctx_ref.shape[0]

    # Assemble the whole (TM, seq, D) tile in vregs, then issue one aligned,
    # unmasked full-tile store (avoids unaligned-sublane masked stores).
    ctx_b = jnp.broadcast_to(ctx_ref[...][None], (tm, n_ctx, d))
    out_ref[...] = jnp.concatenate(
        [prefix_ref[...], ctx_b, suffix_ref[...]], axis=1)


def _choose_tm(n_dm, row_bytes, vmem_budget=12 * 1024 * 1024):
    """Largest row-block TM that (a) fits the double-buffer VMEM budget,
    (b) keeps >= 2 grid blocks when possible (v7x has 2 TensorCores), and
    (c) divides n_dm exactly when such a divisor exists (no ragged last block)."""
    cap = max(1, vmem_budget // max(1, row_bytes))
    if n_dm >= 2:
        cap = max(1, min(cap, n_dm // 2))   # keep the grid >= 2 parallel steps
    cap = min(cap, n_dm)
    for tm in range(cap, 0, -1):            # prefer an exact divisor of n_dm
        if n_dm % tm == 0:
            return tm
    return cap


def domain_class_pl_forward(token_prefix, ctx, token_suffix):
    """prompts = cat([prefix (n_dm,1,D), bcast(ctx (n_ctx,D)), suffix (n_dm,n_suf,D)], axis=1)."""
    n_dm, _, ctx_dim = token_prefix.shape
    n_ctx = ctx.shape[0]
    n_suf = token_suffix.shape[1]
    seq = 1 + n_ctx + n_suf
    dtype = token_prefix.dtype

    # The learnable ctx parameter may live in f32 while the frozen embeddings are
    # fp16/bf16; assemble everything in the embedding dtype (kernel is pure copy).
    ctx = ctx.astype(dtype)

    itemsize = jnp.dtype(dtype).itemsize
    # Double-buffered resident bytes per prompt row:
    #   inputs  (prefix 1 row + suffix n_suf rows) * 2 buffers
    #   output  (seq rows)                         * 2 buffers
    row_bytes = 2 * (1 + n_suf + seq) * ctx_dim * itemsize
    tm = _choose_tm(n_dm, row_bytes)
    grid = (pl.cdiv(n_dm, tm),)

    grid_spec = pltpu.PrefetchScalarGridSpec(
        num_scalar_prefetch=0,
        grid=grid,
        in_specs=[
            pl.BlockSpec((tm, 1, ctx_dim), lambda i: (i, 0, 0)),       # prefix rows [i*tm : (i+1)*tm)
            pl.BlockSpec((n_ctx, ctx_dim), lambda i: (0, 0)),          # shared ctx (constant block)
            pl.BlockSpec((tm, n_suf, ctx_dim), lambda i: (i, 0, 0)),   # suffix rows
        ],
        out_specs=pl.BlockSpec((tm, seq, ctx_dim), lambda i: (i, 0, 0)),
    )

    return pl.pallas_call(
        _domain_class_pl_kernel,
        out_shape=jax.ShapeDtypeStruct((n_dm, seq, ctx_dim), dtype),
        grid_spec=grid_spec,
        compiler_params=pltpu.CompilerParams(
            dimension_semantics=("parallel",)),
    )(token_prefix, ctx, token_suffix)


if __name__ == "__main__":
    # Small synthetic shapes consistent with the module:
    #   n_cls classes x n_dom domains -> n_dm prompts, seq tokens/prompt,
    #   n_ctx learned context tokens, ctx_dim embedding dim.
    n_cls, n_dom = 4, 2
    n_dm = n_cls * n_dom
    n_ctx = 4
    seq = 16                      # (real CLIP uses 77; small stand-in)
    ctx_dim = 128
    dtype = jnp.float32

    key = jax.random.PRNGKey(0)
    k_ctx, k_pre, k_suf = jax.random.split(key, 3)

    # Deterministic synthetic "parameters"/"buffers" (the module __init__ would fill
    # these from CLIP token embeddings; here we init randomly with a fixed key).
    ctx = jax.random.normal(k_ctx, (n_ctx, ctx_dim), dtype)                           # self.ctx
    token_prefix = jax.random.normal(k_pre, (n_dm, 1, ctx_dim), dtype)                # SOS embedding
    token_suffix = jax.random.normal(k_suf, (n_dm, seq - 1 - n_ctx, ctx_dim), dtype)  # class+EOS embs

    prompts = domain_class_pl_forward(token_prefix, ctx, token_suffix)
    prompts = jax.block_until_ready(prompts)

    # Reference: plain JAX concat matching torch.cat([prefix, ctx.expand, suffix], dim=1)
    ctx_expanded = jnp.broadcast_to(ctx[None], (n_dm, n_ctx, ctx_dim))
    ref = jnp.concatenate([token_prefix, ctx_expanded, token_suffix], axis=1)
    assert prompts.shape == (n_dm, seq, ctx_dim)
    assert jnp.array_equal(prompts, ref)

    print("KERNEL_OK")
</pallas_src>

<mosaic_0001>
module attributes {stable_mosaic.version = 11 : i64} {
  func.func @_domain_class_pl_kernel(%arg0: i32, %arg1: memref<4x1x128xf32, #tpu.memory_space<vmem>>, %arg2: memref<4x128xf32, #tpu.memory_space<vmem>>, %arg3: memref<4x11x128xf32, #tpu.memory_space<vmem>>, %arg4: memref<4x16x128xf32, #tpu.memory_space<vmem>>) attributes {dimension_semantics = [#tpu.dimension_semantics<parallel>], iteration_bounds = array<i64: 2>, scalar_prefetch = 0 : i64, scratch_operands = 0 : i64, tpu.core_type = #tpu.core_type<tc>, window_params = [{transform_indices = @transform_0, window_bounds = array<i64: 4, 1, 128>}, {pipeline_mode = #tpu.pipeline_mode<synchronous>, transform_indices = @transform_1, window_bounds = array<i64: 4, 128>}, {transform_indices = @transform_2, window_bounds = array<i64: 4, 11, 128>}, {transform_indices = @transform_3, window_bounds = array<i64: 4, 16, 128>}]} {
    %c0 = arith.constant 0 : index
    %c0_0 = arith.constant 0 : index
    %0 = vector.load %arg2[%c0, %c0_0] : memref<4x128xf32, #tpu.memory_space<vmem>>, vector<4x128xf32>
    %1 = vector.shape_cast %0 : vector<4x128xf32> to vector<1x4x128xf32>
    %2 = vector.shape_cast %1 : vector<1x4x128xf32> to vector<1x4x128xf32>
    %3 = vector.broadcast %2 : vector<1x4x128xf32> to vector<4x4x128xf32>
    %c0_1 = arith.constant 0 : index
    %c0_2 = arith.constant 0 : index
    %c0_3 = arith.constant 0 : index
    %4 = vector.load %arg1[%c0_1, %c0_2, %c0_3] : memref<4x1x128xf32, #tpu.memory_space<vmem>>, vector<4x1x128xf32>
    %c0_4 = arith.constant 0 : index
    %c0_5 = arith.constant 0 : index
    %c0_6 = arith.constant 0 : index
    %5 = vector.load %arg3[%c0_4, %c0_5, %c0_6] : memref<4x11x128xf32, #tpu.memory_space<vmem>>, vector<4x11x128xf32>
    %6 = tpu.concatenate %4, %3, %5 in 1 : vector<4x1x128xf32>, vector<4x4x128xf32>, vector<4x11x128xf32> -> vector<4x16x128xf32>
    %c0_7 = arith.constant 0 : index
    %c0_8 = arith.constant 0 : index
    %c0_9 = arith.constant 0 : index
    %7 = vector.load %arg4[%c0_7, %c0_8, %c0_9] : memref<4x16x128xf32, #tpu.memory_space<vmem>>, vector<4x16x128xf32>
    tpu.vector_store %arg4[%c0_7, %c0_8, %c0_9], %6 {strides = array<i32>} : memref<4x16x128xf32, #tpu.memory_space<vmem>>, vector<4x16x128xf32>,
    return
  }
  func.func @transform_0(%arg0: i32) -> (i32, i32, i32) {
    %c0_i32 = arith.constant 0 : i32
    %c0_i32_0 = arith.constant 0 : i32
    %c0_i32_1 = arith.constant 0 : i32
    return %arg0, %c0_i32, %c0_i32_0 : i32, i32, i32
  }
  func.func @transform_1(%arg0: i32) -> (i32, i32) {
    %c0_i32 = arith.constant 0 : i32
    %c0_i32_0 = arith.constant 0 : i32
    %c0_i32_1 = arith.constant 0 : i32
    return %c0_i32, %c0_i32_0 : i32, i32
  }
  func.func @transform_2(%arg0: i32) -> (i32, i32, i32) {
    %c0_i32 = arith.constant 0 : i32
    %c0_i32_0 = arith.constant 0 : i32
    %c0_i32_1 = arith.constant 0 : i32
    return %arg0, %c0_i32, %c0_i32_0 : i32, i32, i32
  }
  func.func @transform_3(%arg0: i32) -> (i32, i32, i32) {
    %c0_i32 = arith.constant 0 : i32
    %c0_i32_0 = arith.constant 0 : i32
    %c0_i32_1 = arith.constant 0 : i32
    return %arg0, %c0_i32, %c0_i32_0 : i32, i32, i32
  }
}

</mosaic_0001>

<bundles_post_ra>
// kernel: tpu_custom_call.1
= control target key start
LH: loop header
LB: loop body
LE: loop exit
PB: predicated region body
PF: predicated region fallthrough
CT: control target
= control target key end

     0   :  { %8 = vsyncpa [#allocation3], 0  ;;  %s625_s0 = inlined_call_operand.vmem [shape: f32[8,1,128], index: 0, kind: input, shape index: {}]   ;;  %s626_s1 = inlined_call_operand.vmem [shape: f32[4,128], index: 1, kind: input, shape index: {}]   ;;  %s627_s2 = inlined_call_operand.vmem [shape: f32[8,11,128], index: 2, kind: input, shape index: {}]   ;;  %s628_s3 = inlined_call_operand.hbm [shape: f32[8,16,128], index: 3, kind: output, shape index: {}]  }
   0x1   :  { %10 = vsyncpa [#allocation3 + $0x1], 0  ;;  %s488_s12 = smov 0   ;;  %s490_s13 = smov 0  }
   0x2   :  { %s492_s14 = smov 0   ;;  %s494_s15 = smov 0  }
   0x3 LB: > { %s509_s16 = sadd.s32 4294967295, %s463_s15   ;;  %s342_s17 = sadd.s32 4294967294, %s463_s15   ;;  %s463_s15 = sphi %s494_s15, %s634_s15   ;;  %s459_s14 = sphi %s492_s14, %s633_s14   ;;  %s455_s13 = sphi %s490_s13, %s632_s13   ;;  %s451_s12 = sphi %s488_s12, %s631_s12  }
   0x4   : > { %s513_s18 = sadd.s32 1, %s463_s15   ;;  %s96_s19 = sadd.s32 1, %s459_s14 }
   0x5   : > { %s93_s20 = ssub.s32 %s463_s15, %s513_s18  ;;  %p106_p0 = scmp.ne.s32.totalorder %s459_s14, %s455_s13 }
   0x6   : > { %p94_p1 = scmp.eq.s32.totalorder %s93_s20, 0  ;;  %p107_p2 = scmp.eq.s32.totalorder %s509_s16, 1 }
   0x7   : > { %p112_p3 = scmp.ne.s32.totalorder %s455_s13, %s451_s12  ;;  %p113_p4 = scmp.eq.s32.totalorder %s342_s17, 1 }
   0x8   : > { %s524_s21 = scalar_select %p94_p1, %s459_s14, %s96_s19  }
   0x9   : > { %p526_p5 = por %p107_p2, %p106_p0  ;;  %p530_p6 = por %p113_p4, %p112_p3 }
   0xa   : > { %p345_p7 = scmp.ge.s32.totalorder %s463_s15, 1  ;;  %p152_p8 = scmp.lt.s32.totalorder %s463_s15, 3 }
   0xc   : > { %p153_p9 = pnand %p345_p7, %p152_p8 }
   0xd   : > { %s178_s24 = sand.u32 (!%p153_p9), 1, %s455_s13   ;;  %s347_s25 = sshll.u32 (!%p153_p9), %s509_s16, 2  ;;  %v194_v0 = vld [vmem:[%s626_s1] sm:$0xf] (!%p153_p9)  ;;  %vm239_vm0 = vcmask (!%p153_p9), 1040384   ;;  %vm218_vm1 = vcmask (!%p153_p9), 1044480  }
   0xe   : > { %156 = sbr.rel (%p153_p9) target bundleno = 47 (0x2f), region = 32  ;;  %s346_s28 = sshll.u32 (!%p153_p9), %s178_s24, 6  ;;  %v208_v1 = vrot.slane (!%p153_p9), %v194_v0, 7 }
   0xf   : > { %p182_p10 = scmp.lt.s32.totalorder (!%p153_p9), %s347_s25, 7  ;;  %s550_s9 = scalar_lea.vmem (!%p153_p9), [#allocation2], %s346_s28 }
  0x10   : > { %s271_s10 = sshll.u32 (!%p153_p9), %s550_s9, 4  ;;  %s359_s11 = sshll.u32 (!%p153_p9), %s509_s16, 10  ;;  %s565_s10 = int_to_ptr.vmem [resolvable:$true] %s271_s10 }
  0x11   : > { %s575_s20 = scalar_lea.hbm (!%p153_p9), %s628_s3, %s359_s11  ;;  %s401_s26 = scalar_lea.vmem (!%p153_p9), %s565_s10, 1024 }
  0x12   : > { %p402_p11 = scmp.ne.s32.totalorder (!%p153_p9), %s565_s10, %s401_s26  ;;  %s465_s16 = smov (!%p153_p9), [#allocation2]  }
  0x13   : > { %s405_s27 = sshll.u32 (!%p153_p9), %s465_s16, 4  ;;  %s406_s27 = int_to_ptr.vmem [resolvable:$false] %s405_s27 }
  0x14   : > { %p403_p12 = pnand (!%p153_p9), %p402_p11, %p526_p5  ;;  %s407_s28 = scalar_lea.vmem (!%p153_p9), %s406_s27, 2048 }
  0x15   : > { %s636_s25 = smov (!%p182_p10, %s347_s25), 7  ;;  %p408_p0 = scmp.lt.s32.totalorder %s565_s10, %s406_s27 }
  0x16   : > { %s184_s4 = scalar_lea.vmem %s625_s0, %s636_s25  ;;  %s357_s5 = sshll.u32 %s636_s25, 4 }
  0x17   : > { %s191_s8 = scalar_lea.vmem %s627_s2, %s357_s5  ;;  %v195_v2 = vld [vmem:[%s184_s4] sm:$0x1]  ;;  %v196_v3 = vld [vmem:[%s184_s4 + $0x1] sm:$0x1]  ;;  %v197_v4 = vld [vmem:[%s184_s4 + $0x2] sm:$0x1]  ;;  %p404_p13 = pneg %p403_p12 }
  0x18   : > { %v199_v5 = vld [vmem:[%s191_s8] sm:$0xff]  ;;  %v240_v6 = vsel %vm239_vm0, %v195_v2, %v208_v1  ;;  %v200_v7 = vld [vmem:[%s191_s8 + $0x8] sm:$0x7]  ;;  %v201_v8 = vld [vmem:[%s191_s8 + $0x10] sm:$0xff]  ;;  %v241_v9 = vsel %vm239_vm0, %v196_v3, %v208_v1  ;;  %v242_v15 = vsel %vm239_vm0, %v197_v4, %v208_v1  ;;  %s584_s25 = scalar_lea.sflag [#allocation3], %s178_s24  ;;  %p409_p1 = scmp.lt.s32.totalorder %s407_s28, %s401_s26 }
  0x19   : > { %v219_v10 = vrot.slane %v199_v5, 3  ;;  %v220_v11 = vrot.slane %v200_v7, 3  ;;  %v222_v12 = vrot.slane %v201_v8, 3  ;;  %v202_v13 = vld [vmem:[%s191_s8 + $0x18] sm:$0x7]  ;;  %v203_v14 = vld [vmem:[%s191_s8 + $0x20] sm:$0xff] }
  0x1a   : > { %v223_v16 = vrot.slane %v202_v13, 3  ;;  %v225_v17 = vrot.slane %v203_v14, 3  ;;  %v204_v18 = vld [vmem:[%s191_s8 + $0x28] sm:$0x7]  ;;  %v198_v19 = vld [vmem:[%s184_s4 + $0x3] sm:$0x1]  ;;  %p410_p2 = por %p409_p1, %p408_p0 }
  0x1b   : > { %v244_v20 = vsel %vm218_vm1, %v240_v6, %v219_v10  ;;  %v221_v21 = vsel %vm218_vm1, %v219_v10, %v220_v11  ;;  %v245_v22 = vsel %vm218_vm1, %v241_v9, %v222_v12  ;;  %v226_v23 = vrot.slane %v204_v18, 3  ;;  %v205_v24 = vld [vmem:[%s191_s8 + $0x30] sm:$0xff]  ;;  %v206_v25 = vld [vmem:[%s191_s8 + $0x38] sm:$0x7] }
  0x1c   : > { %248 = vst [vmem:[%s550_s9] sm:$0xff] %v244_v20  ;;  %249 = vst [vmem:[%s550_s9 + $0x8] sm:$0xff] %v221_v21  ;;  %v224_v26 = vsel %vm218_vm1, %v222_v12, %v223_v16  ;;  %v246_v27 = vsel %vm218_vm1, %v242_v15, %v225_v17  ;;  %v228_v28 = vrot.slane %v205_v24, 3  ;;  %v243_v29 = vsel %vm239_vm0, %v198_v19, %v208_v1  ;;  %p411_p3 = pnand %p410_p2, %p404_p13 }
  0x1d   : > { %250 = vst [vmem:[%s550_s9 + $0x10] sm:$0xff] %v245_v22  ;;  %251 = vst [vmem:[%s550_s9 + $0x18] sm:$0xff] %v224_v26  ;;  %v227_v30 = vsel %vm218_vm1, %v225_v17, %v226_v23  ;;  %v229_v31 = vrot.slane %v206_v25, 3 }
  0x1e   : > { %252 = vst [vmem:[%s550_s9 + $0x20] sm:$0xff] %v246_v27  ;;  %253 = vst [vmem:[%s550_s9 + $0x28] sm:$0xff] %v227_v30  ;;  %v247_v32 = vsel %vm218_vm1, %v243_v29, %v228_v28 }
  0x1f   : > { %254 = vst [vmem:[%s550_s9 + $0x30] sm:$0xff] %v247_v32  ;;  %v230_v33 = vsel %vm218_vm1, %v228_v28, %v229_v31 }
  0x20   : > { %255 = vst [vmem:[%s550_s9 + $0x38] sm:$0xff] %v230_v33 }
  0x21   : > { %414 = shalt.err (!%p411_p3)
}
  0x22   : > { %s415_s24 = scalar_lea.hbm %s575_s20, 1024  ;;  %s419_s4 = scalar_lea.hbm %s628_s3, 2048 }
  0x23   : > { %p416_p4 = scmp.ne.s32.totalorder %s575_s20, %s415_s24  ;;  %p420_p9 = scmp.lt.u32.totalorder %s575_s20, %s628_s3 }
  0x24   : > { %p421_p10 = scmp.lt.u32.totalorder %s419_s4, %s415_s24  ;;  %p423_p12 = scmp.lt.u32.totalorder %s415_s24, %s575_s20 }
  0x25   : > { %p417_p7 = pnand %p416_p4, %p526_p5 }
  0x26   : > { %p422_p11 = por %p421_p10, %p420_p9 }
  0x27   : > { %p418_p8 = pneg %p417_p7 }
  0x28   : > { %p424_p13 = por %p423_p12, %p422_p11 }
  0x2a   : > { %p425_p0 = pnand %p424_p13, %p418_p8 }
  0x2c   : > { %428 = shalt.err (!%p425_p0)
}
  0x2d   : > { %s466_s7 = smov 128   ;;  %s467_s8 = smov 8  }
  0x2e   : > { %360 = dma.vmem_to_hbm [thread:$0]  (%p526_p5), %s565_s10, 1024, %s575_s20, %s584_s25, %s466_s7, %s466_s7, %s467_s8  }
  0x2f PF: > { %p366_p1 = scmp.ge.s32.totalorder %s463_s15, 2  ;;  %s286_s9 = sand.u32 1, %s451_s12  }
  0x30   : > { %s287_s11 = scalar_lea.sflag [#allocation3], %s286_s9 }
  0x31   : > { %p363_p2 = pnand %p366_p1, %p530_p6 }
  0x33   : > { %446 = dma.done.wait (!%p363_p2), %s287_s11, 1024  }
  0x34   : > { %448 = vsyncadd (!%p363_p2), %s287_s11, 4294966272  ;;  %p13_p3 = scmp.ge.s32.totalorder %s513_s18, 4   ;;  %s631_s12 = smov %s455_s13 }
  0x35   : > { %s632_s13 = smov %s459_s14  ;;  %s633_s14 = smov %s524_s21 }
  0x36   : > { %s634_s15 = smov %s513_s18  ;;  %15 = sbr.rel (!%p13_p3) target bundleno = 3 (0x3), region = 70 }
  0x3d   :  { %292 = vsyncpa [#allocation3], 1 }
  0x3e   :  { %294 = vsyncpa [#allocation3 + $0x1], 1 }

</bundles_post_ra>
